<compile_context>
chip_gen: v7x
topology: tpu7x:2x2x1
jax: 0.10.0
libtpu: 0.0.40
codegen_flags: <defaults>
</compile_context>

<pallas_src>
import functools

import jax
import jax.numpy as jnp
from jax.experimental import pallas as pl
from jax.experimental.pallas import tpu as pltpu

SUBLANE = 8


def _round_up(x, m):
    return (x + m - 1) // m * m


def dqn_forward_kernel(x_ref, w1_ref, b1_ref, w2_ref, b2_ref, w3_ref, b3_ref,
                       out_ref):
    """One batch tile: out = fc3(relu(fc2(relu(fc1(x)))))."""
    mm_dtype = w1_ref.dtype                                      # matmul operand dtype
    x = x_ref[...].astype(mm_dtype)                              # in-kernel cast (f32 -> bf16)

    h1 = jnp.dot(x, w1_ref[...], preferred_element_type=jnp.float32)
    h1 = jnp.maximum(h1 + b1_ref[...], 0.0)                      # f32 [TB, fc1]

    h2 = jnp.dot(h1.astype(mm_dtype), w2_ref[...],
                 preferred_element_type=jnp.float32)
    h2 = jnp.maximum(h2 + b2_ref[...], 0.0)                      # f32 [TB, fc2]

    a = jnp.dot(h2.astype(mm_dtype), w3_ref[...],
                preferred_element_type=jnp.float32)
    out_ref[...] = (a + b3_ref[...]).astype(out_ref.dtype)       # [TB, n_actions]


def prepare_params(params, matmul_dtype=jnp.bfloat16):
    """One-time conversion of PyTorch-convention params to kernel layout.

    - weights transposed to (in, out) and cast to `matmul_dtype`
      (bf16 recommended on v5e/v6e/v7x; f32 available for exact checks),
    - biases kept as f32 [1, dim] rows,
    - NO padding of fc3: output stays n_actions wide.
    """
    return {
        "w1": params["w1"].T.astype(matmul_dtype),
        "b1": params["b1"][None, :].astype(jnp.float32),
        "w2": params["w2"].T.astype(matmul_dtype),
        "b2": params["b2"][None, :].astype(jnp.float32),
        "w3": params["w3"].T.astype(matmul_dtype),
        "b3": params["b3"][None, :].astype(jnp.float32),
    }


@functools.partial(jax.jit, static_argnames=("tile_batch",))
def dqn_forward(state, kparams, tile_batch=2048):
    """Pallas forward pass of DeepQNetwork.

    state:   [B, input_dims] float32 (cast to matmul dtype inside the kernel)
    kparams: output of prepare_params(...)
    returns: [B, n_actions] float32   (no padding, no post-slice)
    """
    B = state.shape[0]
    w1, b1 = kparams["w1"], kparams["b1"]
    w2, b2 = kparams["w2"], kparams["b2"]
    w3, b3 = kparams["w3"], kparams["b3"]

    d_in, fc1 = w1.shape
    fc2 = w2.shape[1]
    n_actions = w3.shape[1]

    # Batch tiling: weights stay VMEM-resident, activation tiles are pipelined.
    # Big tiles amortize the ~0.35us/step overhead; cap so that large batches
    # produce >=2 grid steps (lets v7x's 2 TensorCores split the parallel axis).
    tb = min(tile_batch, _round_up(B, SUBLANE))
    if B >= 4 * SUBLANE:
        tb = min(tb, _round_up(pl.cdiv(B, 2), SUBLANE))
    grid = pl.cdiv(B, tb)                 # partial last block handled by Pallas

    batch_map = lambda i: (i, 0)          # tiled along batch
    const_map = lambda i: (0, 0)          # VMEM-resident across all tiles

    flops = 2 * B * (d_in * fc1 + fc1 * fc2 + fc2 * n_actions)
    bytes_accessed = (
        state.size * jnp.dtype(state.dtype).itemsize
        + sum(a.size * jnp.dtype(a.dtype).itemsize
              for a in (w1, b1, w2, b2, w3, b3))
        + B * n_actions * 4)

    out = pl.pallas_call(
        dqn_forward_kernel,
        out_shape=jax.ShapeDtypeStruct((B, n_actions), jnp.float32),
        grid=(grid,),
        in_specs=[
            pl.BlockSpec((tb, d_in), batch_map),
            pl.BlockSpec((d_in, fc1), const_map),
            pl.BlockSpec((1, fc1), const_map),
            pl.BlockSpec((fc1, fc2), const_map),
            pl.BlockSpec((1, fc2), const_map),
            pl.BlockSpec((fc2, n_actions), const_map),
            pl.BlockSpec((1, n_actions), const_map),
        ],
        out_specs=pl.BlockSpec((tb, n_actions), batch_map),
        compiler_params=pltpu.CompilerParams(
            dimension_semantics=("parallel",)),
        cost_estimate=pl.CostEstimate(
            flops=flops, transcendentals=0, bytes_accessed=bytes_accessed),
    )(state, w1, b1, w2, b2, w3, b3)

    return out


def init_params(key, input_dims, fc1_dims, fc2_dims, n_actions):
    """Deterministic synthetic init matching nn.Linear parameter shapes."""
    ks = jax.random.split(key, 6)

    def uniform(k, shape, fan_in):
        bound = 1.0 / jnp.sqrt(fan_in)
        return jax.random.uniform(k, shape, jnp.float32, -bound, bound)

    return {
        "w1": uniform(ks[0], (fc1_dims, input_dims), input_dims),
        "b1": uniform(ks[1], (fc1_dims,), input_dims),
        "w2": uniform(ks[2], (fc2_dims, fc1_dims), fc1_dims),
        "b2": uniform(ks[3], (fc2_dims,), fc1_dims),
        "w3": uniform(ks[4], (n_actions, fc2_dims), fc2_dims),
        "b3": uniform(ks[5], (n_actions,), fc2_dims),
    }


def ref_forward(state, params, matmul_dtype):
    """Plain-JAX reference with the same precision policy as the kernel."""
    def mm(x, w):
        return jnp.dot(x.astype(matmul_dtype), w.T.astype(matmul_dtype),
                       preferred_element_type=jnp.float32)
    h1 = jax.nn.relu(mm(state, params["w1"]) + params["b1"])
    h2 = jax.nn.relu(mm(h1, params["w2"]) + params["b2"])
    return mm(h2, params["w3"]) + params["b3"]


if __name__ == "__main__":
    # Lunar-lander-like config: 8-dim observation, 4 actions.
    batch, input_dims, fc1_dims, fc2_dims, n_actions = 8, 8, 128, 128, 4

    key = jax.random.PRNGKey(0)
    pkey, xkey = jax.random.split(key)
    params = init_params(pkey, input_dims, fc1_dims, fc2_dims, n_actions)
    state = jax.random.normal(xkey, (batch, input_dims), jnp.float32)

    # f32 matmul path: tight check against the PyTorch-equivalent reference.
    kparams_f32 = prepare_params(params, matmul_dtype=jnp.float32)
    out_f32 = dqn_forward(state, kparams_f32)
    jax.block_until_ready(out_f32)
    ref_f32 = ref_forward(state, params, jnp.float32)
    assert out_f32.shape == (batch, n_actions)
    assert jnp.allclose(out_f32, ref_f32, atol=1e-5, rtol=1e-5)

    # bf16 matmul fast path (recommended on v5e/v6e/v7x): same-precision reference.
    kparams_bf16 = prepare_params(params, matmul_dtype=jnp.bfloat16)
    out_bf16 = dqn_forward(state, kparams_bf16)
    jax.block_until_ready(out_bf16)
    ref_bf16 = ref_forward(state, params, jnp.bfloat16)
    assert out_bf16.shape == (batch, n_actions)
    assert jnp.allclose(out_bf16, ref_bf16, atol=2e-3, rtol=2e-3)

    # Exercise the multi-step grid + masked partial last block (B=1000 -> 2 tiles).
    big_state = jax.random.normal(jax.random.PRNGKey(1), (1000, input_dims),
                                  jnp.float32)
    out_big = dqn_forward(big_state, kparams_bf16)
    jax.block_until_ready(out_big)
    ref_big = ref_forward(big_state, params, jnp.bfloat16)
    assert out_big.shape == (1000, n_actions)
    assert jnp.allclose(out_big, ref_big, atol=2e-3, rtol=2e-3)

    print("KERNEL_OK")
</pallas_src>

<mosaic_0001>
module attributes {stable_mosaic.version = 11 : i64} {
  func.func @dqn_forward_kernel(%arg0: i32, %arg1: memref<8x8xf32, #tpu.memory_space<vmem>>, %arg2: memref<8x128xf32, #tpu.memory_space<vmem>>, %arg3: memref<1x128xf32, #tpu.memory_space<vmem>>, %arg4: memref<128x128xf32, #tpu.memory_space<vmem>>, %arg5: memref<1x128xf32, #tpu.memory_space<vmem>>, %arg6: memref<128x4xf32, #tpu.memory_space<vmem>>, %arg7: memref<1x4xf32, #tpu.memory_space<vmem>>, %arg8: memref<8x4xf32, #tpu.memory_space<vmem>>) attributes {dimension_semantics = [#tpu.dimension_semantics<parallel>], iteration_bounds = array<i64: 1>, scalar_prefetch = 0 : i64, scratch_operands = 0 : i64, tpu.core_type = #tpu.core_type<tc>, window_params = [{transform_indices = @transform_0, window_bounds = array<i64: 8, 8>}, {pipeline_mode = #tpu.pipeline_mode<synchronous>, transform_indices = @transform_1, window_bounds = array<i64: 8, 128>}, {pipeline_mode = #tpu.pipeline_mode<synchronous>, transform_indices = @transform_2, window_bounds = array<i64: 1, 128>}, {pipeline_mode = #tpu.pipeline_mode<synchronous>, transform_indices = @transform_3, window_bounds = array<i64: 128, 128>}, {pipeline_mode = #tpu.pipeline_mode<synchronous>, transform_indices = @transform_4, window_bounds = array<i64: 1, 128>}, {pipeline_mode = #tpu.pipeline_mode<synchronous>, transform_indices = @transform_5, window_bounds = array<i64: 128, 4>}, {pipeline_mode = #tpu.pipeline_mode<synchronous>, transform_indices = @transform_6, window_bounds = array<i64: 1, 4>}, {transform_indices = @transform_7, window_bounds = array<i64: 8, 4>}]} {
    %c0 = arith.constant 0 : index
    %c0_0 = arith.constant 0 : index
    %0 = vector.load %arg1[%c0, %c0_0] : memref<8x8xf32, #tpu.memory_space<vmem>>, vector<8x8xf32>
    %c0_1 = arith.constant 0 : index
    %c0_2 = arith.constant 0 : index
    %1 = vector.load %arg2[%c0_1, %c0_2] : memref<8x128xf32, #tpu.memory_space<vmem>>, vector<8x128xf32>
    %cst = arith.constant dense<0.000000e+00> : vector<8x128xf32>
    %2 = tpu.matmul %0, %1, %cst {dimension_numbers = #tpu.dot_dimension_numbers<[1], [0], [0], [1], [0, 0, 1, 1], [], []>} : vector<8x8xf32>, vector<8x128xf32>, vector<8x128xf32> -> vector<8x128xf32>
    %c0_3 = arith.constant 0 : index
    %c0_4 = arith.constant 0 : index
    %3 = vector.load %arg3[%c0_3, %c0_4] : memref<1x128xf32, #tpu.memory_space<vmem>>, vector<1x128xf32>
    %4 = vector.broadcast %3 : vector<1x128xf32> to vector<8x128xf32>
    %5 = arith.addf %2, %4 : vector<8x128xf32>
    %cst_5 = arith.constant 0.000000e+00 : f32
    %6 = vector.broadcast %cst_5 : f32 to vector<8x128xf32>
    %7 = arith.maximumf %5, %6 : vector<8x128xf32>
    %c0_6 = arith.constant 0 : index
    %c0_7 = arith.constant 0 : index
    %8 = vector.load %arg4[%c0_6, %c0_7] : memref<128x128xf32, #tpu.memory_space<vmem>>, vector<128x128xf32>
    %cst_8 = arith.constant dense<0.000000e+00> : vector<8x128xf32>
    %9 = tpu.matmul %7, %8, %cst_8 {dimension_numbers = #tpu.dot_dimension_numbers<[1], [0], [0], [1], [0, 0, 1, 1], [], []>} : vector<8x128xf32>, vector<128x128xf32>, vector<8x128xf32> -> vector<8x128xf32>
    %c0_9 = arith.constant 0 : index
    %c0_10 = arith.constant 0 : index
    %10 = vector.load %arg5[%c0_9, %c0_10] : memref<1x128xf32, #tpu.memory_space<vmem>>, vector<1x128xf32>
    %11 = vector.broadcast %10 : vector<1x128xf32> to vector<8x128xf32>
    %12 = arith.addf %9, %11 : vector<8x128xf32>
    %cst_11 = arith.constant 0.000000e+00 : f32
    %13 = vector.broadcast %cst_11 : f32 to vector<8x128xf32>
    %14 = arith.maximumf %12, %13 : vector<8x128xf32>
    %c0_12 = arith.constant 0 : index
    %c0_13 = arith.constant 0 : index
    %15 = vector.load %arg6[%c0_12, %c0_13] : memref<128x4xf32, #tpu.memory_space<vmem>>, vector<128x4xf32>
    %cst_14 = arith.constant dense<0.000000e+00> : vector<8x4xf32>
    %16 = tpu.matmul %14, %15, %cst_14 {dimension_numbers = #tpu.dot_dimension_numbers<[1], [0], [0], [1], [0, 0, 1, 1], [], []>} : vector<8x128xf32>, vector<128x4xf32>, vector<8x4xf32> -> vector<8x4xf32>
    %c0_15 = arith.constant 0 : index
    %c0_16 = arith.constant 0 : index
    %17 = vector.load %arg7[%c0_15, %c0_16] : memref<1x4xf32, #tpu.memory_space<vmem>>, vector<1x4xf32>
    %18 = vector.broadcast %17 : vector<1x4xf32> to vector<8x4xf32>
    %19 = arith.addf %16, %18 : vector<8x4xf32>
    %c0_17 = arith.constant 0 : index
    %c0_18 = arith.constant 0 : index
    %20 = vector.load %arg8[%c0_17, %c0_18] : memref<8x4xf32, #tpu.memory_space<vmem>>, vector<8x4xf32>
    tpu.vector_store %arg8[%c0_17, %c0_18], %19 {strides = array<i32>} : memref<8x4xf32, #tpu.memory_space<vmem>>, vector<8x4xf32>,
    return
  }
  func.func @transform_0(%arg0: i32) -> (i32, i32) {
    %c0_i32 = arith.constant 0 : i32
    %c0_i32_0 = arith.constant 0 : i32
    return %arg0, %c0_i32 : i32, i32
  }
  func.func @transform_1(%arg0: i32) -> (i32, i32) {
    %c0_i32 = arith.constant 0 : i32
    %c0_i32_0 = arith.constant 0 : i32
    %c0_i32_1 = arith.constant 0 : i32
    return %c0_i32, %c0_i32_0 : i32, i32
  }
  func.func @transform_2(%arg0: i32) -> (i32, i32) {
    %c0_i32 = arith.constant 0 : i32
    %c0_i32_0 = arith.constant 0 : i32
    %c0_i32_1 = arith.constant 0 : i32
    return %c0_i32, %c0_i32_0 : i32, i32
  }
  func.func @transform_3(%arg0: i32) -> (i32, i32) {
    %c0_i32 = arith.constant 0 : i32
    %c0_i32_0 = arith.constant 0 : i32
    %c0_i32_1 = arith.constant 0 : i32
    return %c0_i32, %c0_i32_0 : i32, i32
  }
  func.func @transform_4(%arg0: i32) -> (i32, i32) {
    %c0_i32 = arith.constant 0 : i32
    %c0_i32_0 = arith.constant 0 : i32
    %c0_i32_1 = arith.constant 0 : i32
    return %c0_i32, %c0_i32_0 : i32, i32
  }
  func.func @transform_5(%arg0: i32) -> (i32, i32) {
    %c0_i32 = arith.constant 0 : i32
    %c0_i32_0 = arith.constant 0 : i32
    %c0_i32_1 = arith.constant 0 : i32
    return %c0_i32, %c0_i32_0 : i32, i32
  }
  func.func @transform_6(%arg0: i32) -> (i32, i32) {
    %c0_i32 = arith.constant 0 : i32
    %c0_i32_0 = arith.constant 0 : i32
    %c0_i32_1 = arith.constant 0 : i32
    return %c0_i32, %c0_i32_0 : i32, i32
  }
  func.func @transform_7(%arg0: i32) -> (i32, i32) {
    %c0_i32 = arith.constant 0 : i32
    %c0_i32_0 = arith.constant 0 : i32
    return %arg0, %c0_i32 : i32, i32
  }
}

</mosaic_0001>

<bundles_post_ra>
// kernel: dqn_forward.1
= control target key start
LH: loop header
LB: loop body
LE: loop exit
PB: predicated region body
PF: predicated region fallthrough
CT: control target
= control target key end

     0   :  { %vm35_vm0 = vcmask 64512   ;;  %v469_v0 = vmov 0.0   ;;  %vm470_vm1 = vmmov 0   ;;  %v471_v4 = vmov 0.0|0.0   ;;  %s642_s1 = inlined_call_operand.vmem [shape: f32[8,128], index: 1, kind: input, shape index: {}]   ;;  %s643_s0 = inlined_call_operand.vmem [shape: f32[8,8], index: 0, kind: input, shape index: {}]   ;;  %s644_s3 = inlined_call_operand.vmem [shape: f32[128,128], index: 3, kind: input, shape index: {}]   ;;  %s645_s5 = inlined_call_operand.vmem [shape: f32[128,4], index: 5, kind: input, shape index: {}]   ;;  %s646_s2 = inlined_call_operand.vmem [shape: f32[1,128], index: 2, kind: input, shape index: {}]   ;;  %s647_s4 = inlined_call_operand.vmem [shape: f32[1,128], index: 4, kind: input, shape index: {}]   ;;  %s648_s6 = inlined_call_operand.vmem [shape: f32[1,4], index: 6, kind: input, shape index: {}]   ;;  %s649_s7 = inlined_call_operand.vmem [shape: f32[8,4], index: 7, kind: output, shape index: {}]  }
   0x1   :  { %343 = vmatprep.subr.mxu0 %v469_v0  ;;  %v27_v1 = vld [vmem:[%s642_s1] sm:$0xff]  ;;  %345 = vmatprep.mubr.msk.f32.mxu0 %vm470_vm1, %v469_v0  ;;  %v111_v5 = vld [vmem:[%s644_s3 + $0x8] sm:$0xff]  ;;  %v112_v6 = vld [vmem:[%s644_s3 + $0x10] sm:$0xff]  ;;  %vm297_vm2 = vcmask 31744  }
   0x2   :  { %v26_v2 = vld [vmem:[%s643_s0] sm:$0xff]  ;;  %344 = vmatpush3.msra.mxu0 %v27_v1  ;;  %418 = vmatprep.subr.bf16.mxu1 %v471_v4  ;;  %v113_v7 = vld [vmem:[%s644_s3 + $0x18] sm:$0xff]  ;;  %v115_v11 = vld [vmem:[%s644_s3 + $0x28] sm:$0xff] }
   0x3   :  { %v110_v3 = vld [vmem:[%s644_s3] sm:$0xff]  ;;  %346 = vmatmul.mubr.msk.f32.vlgmr.msra.gmra.mrb[0].mxu0 %vm35_vm0, %v26_v2  ;;  %380 = vmatprep.mubr.msk.f32.mxu1 %vm470_vm1, %v469_v0  ;;  %v422_v9 = vpack.c.bf16 %v113_v7, %v112_v6  ;;  %v116_v13 = vld [vmem:[%s644_s3 + $0x30] sm:$0xff]  ;;  %v117_v14 = vld [vmem:[%s644_s3 + $0x38] sm:$0xff] }
   0x4   :  { %v419_v8 = vpack.c.bf16 %v111_v5, %v110_v3  ;;  %442 = vmatprep.subr.bf16.mxu0 %v471_v4  ;;  %415 = vmatprep.mubr.msk.f32.mxu0 %vm470_vm1, %v469_v0  ;;  %v114_v10 = vld [vmem:[%s644_s3 + $0x20] sm:$0xff]  ;;  %v428_v15 = vpack.c.bf16 %v117_v14, %v116_v13  ;;  %v119_v17 = vld [vmem:[%s644_s3 + $0x48] sm:$0xff]  ;;  %v120_v19 = vld [vmem:[%s644_s3 + $0x50] sm:$0xff] }
   0x5   :  { %v425_v12 = vpack.c.bf16 %v115_v11, %v114_v10  ;;  %v118_v16 = vld [vmem:[%s644_s3 + $0x40] sm:$0xff]  ;;  %v121_v20 = vld [vmem:[%s644_s3 + $0x58] sm:$0xff]  ;;  %v123_v23 = vld [vmem:[%s644_s3 + $0x68] sm:$0xff] }
   0x6   :  { %420 = vmatpush3.bf16.msra.mxu1 %v419_v8  ;;  %v431_v18 = vpack.c.bf16 %v119_v17, %v118_v16  ;;  %v434_v21 = vpack.c.bf16 %v121_v20, %v120_v19  ;;  %v122_v22 = vld [vmem:[%s644_s3 + $0x60] sm:$0xff]  ;;  %v124_v25 = vld [vmem:[%s644_s3 + $0x70] sm:$0xff]  ;;  %v125_v26 = vld [vmem:[%s644_s3 + $0x78] sm:$0xff] }
   0x7   :  { %421 = vmatprep.subr.bf16.mxu1 %v471_v4  ;;  %v437_v24 = vpack.c.bf16 %v123_v23, %v122_v22  ;;  %v440_v27 = vpack.c.bf16 %v125_v26, %v124_v25  ;;  %v204_v28 = vld [vmem:[%s645_s5] sm:$0xff]  ;;  %v205_v29 = vld [vmem:[%s645_s5 + $0x8] sm:$0xff]  ;;  %v206_v30 = vld [vmem:[%s645_s5 + $0x10] sm:$0xff] }
   0x8   :  { %v443_v31 = vpack.c.bf16 %v205_v29, %v204_v28  ;;  %v207_v32 = vld [vmem:[%s645_s5 + $0x18] sm:$0xff]  ;;  %v208_v34 = vld [vmem:[%s645_s5 + $0x20] sm:$0xff]  ;;  %v209_v35 = vld [vmem:[%s645_s5 + $0x28] sm:$0xff] }
   0x9   :  { %v446_v33 = vpack.c.bf16 %v207_v32, %v206_v30  ;;  %v449_v36 = vpack.c.bf16 %v209_v35, %v208_v34  ;;  %v210_v37 = vld [vmem:[%s645_s5 + $0x30] sm:$0xff]  ;;  %v211_v38 = vld [vmem:[%s645_s5 + $0x38] sm:$0xff]  ;;  %v212_v40 = vld [vmem:[%s645_s5 + $0x40] sm:$0xff] }
   0xa   :  { %423 = vmatpush3.bf16.msra.mxu1 %v422_v9  ;;  %444 = vmatpush3.bf16.msra.mxu0 %v443_v31  ;;  %v452_v39 = vpack.c.bf16 %v211_v38, %v210_v37  ;;  %v213_v41 = vld [vmem:[%s645_s5 + $0x48] sm:$0xff]  ;;  %v214_v43 = vld [vmem:[%s645_s5 + $0x50] sm:$0xff]  ;;  %v215_v44 = vld [vmem:[%s645_s5 + $0x58] sm:$0xff] }
   0xb   :  { %424 = vmatprep.subr.bf16.mxu1 %v471_v4  ;;  %445 = vmatprep.subr.bf16.mxu0 %v471_v4  ;;  %v455_v42 = vpack.c.bf16 %v213_v41, %v212_v40  ;;  %v458_v45 = vpack.c.bf16 %v215_v44, %v214_v43  ;;  %v216_v46 = vld [vmem:[%s645_s5 + $0x60] sm:$0xff]  ;;  %v217_v47 = vld [vmem:[%s645_s5 + $0x68] sm:$0xff]  ;;  %v218_v54 = vld [vmem:[%s645_s5 + $0x70] sm:$0xff] }
   0xc   :  { %v461_v48 = vpack.c.bf16 %v217_v47, %v216_v46  ;;  %v303_v49 = vld [vmem:[%s646_s2] ss:$0 sm:$0xff]  ;;  %v219_v55 = vld [vmem:[%s645_s5 + $0x78] sm:$0xff] }
   0xd   :  { %v464_v56 = vpack.c.bf16 %v219_v55, %v218_v54  ;;  %v305_v57 = vld [vmem:[%s647_s4] ss:$0 sm:$0xff] }
   0xe   :  { %426 = vmatpush3.bf16.msra.mxu1 %v425_v12  ;;  %447 = vmatpush3.bf16.msra.mxu0 %v446_v33  ;;  %v306_v62 = vld [vmem:[%s648_s6] ss:$0 sm:$0xff] }
   0xf   :  { %427 = vmatprep.subr.bf16.mxu1 %v471_v4  ;;  %448 = vmatprep.subr.bf16.mxu0 %v471_v4 }
  0x12   :  { %429 = vmatpush3.bf16.msra.mxu1 %v428_v15  ;;  %450 = vmatpush3.bf16.msra.mxu0 %v449_v36 }
  0x13   :  { %430 = vmatprep.subr.bf16.mxu1 %v471_v4  ;;  %451 = vmatprep.subr.bf16.mxu0 %v471_v4 }
  0x16   :  { %432 = vmatpush3.bf16.msra.mxu1 %v431_v18  ;;  %453 = vmatpush3.bf16.msra.mxu0 %v452_v39 }
  0x17   :  { %433 = vmatprep.subr.bf16.mxu1 %v471_v4  ;;  %454 = vmatprep.subr.bf16.mxu0 %v471_v4 }
  0x1a   :  { %435 = vmatpush3.bf16.msra.mxu1 %v434_v21  ;;  %456 = vmatpush3.bf16.msra.mxu0 %v455_v42 }
  0x1b   :  { %436 = vmatprep.subr.bf16.mxu1 %v471_v4  ;;  %457 = vmatprep.subr.bf16.mxu0 %v471_v4 }
  0x1e   :  { %438 = vmatpush3.bf16.msra.mxu1 %v437_v24  ;;  %459 = vmatpush3.bf16.msra.mxu0 %v458_v45 }
  0x1f   :  { %439 = vmatprep.subr.bf16.mxu1 %v471_v4  ;;  %460 = vmatprep.subr.bf16.mxu0 %v471_v4 }
  0x22   :  { %441 = vmatpush3.bf16.msra.mxu1 %v440_v27  ;;  %462 = vmatpush3.bf16.msra.mxu0 %v461_v48 }
  0x23   :  { %463 = vmatprep.subr.bf16.mxu0 %v471_v4 }
  0x26   :  { %465 = vmatpush3.bf16.msra.mxu0 %v464_v56 }
  0xd6   :  { %v105_v50 = vpop.f32.mrb[0].mxu0 }
  0xd7   :  { %v106_v51 = vadd.f32 %v303_v49, %v105_v50  ;;  %v347_v52 = vpop.f32.mrb[1].mxu0 }
  0xd9   :  { %v109_v53 = vmax.f32 %v106_v51, 0.0 }
  0xdb   :  { %381 = vmatmul.mubr.f32.vlgmr.msra.gmra.mrb[0].mxu1 %v109_v53 }
 0x1ae   :  { %v199_v58 = vpop.f32.mrb[0].mxu1 }
 0x1af   :  { %v200_v59 = vadd.f32 %v305_v57, %v199_v58  ;;  %v382_v60 = vpop.f32.mrb[1].mxu1 }
 0x1b1   :  { %v203_v61 = vmax.f32 %v200_v59, 0.0 }
 0x1b3   :  { %416 = vmatmul.mubr.f32.vlgmr.msra.gmra.mrb[2].mxu0 %v203_v61 }
 0x286   :  { %v293_v63 = vpop.f32.mrb[2].mxu0 }
 0x287   :  { %v294_v0 = vadd.f32 %v306_v62, %v293_v63  ;;  %v417_v1 = vpop.f32.mrb[3].mxu0 }
 0x289   :  { %298 = vst.msk [vmem:[%s649_s7] sm:$0xff] %vm297_vm2, %v294_v0 }

</bundles_post_ra>
